<compile_context>
chip_gen: v7x
topology: tpu7x:2x2x1
jax: 0.10.0
libtpu: 0.0.40
codegen_flags: <defaults>
</compile_context>

<pallas_src>
import functools

import jax
import jax.numpy as jnp
from jax.experimental import pallas as pl
from jax.experimental.pallas import tpu as pltpu


_LANE = 128          # minimum feature-dim padding (lane width)
_SUBLANE = 16        # row tiles kept multiples of 16 (bf16 sublane packing)


def _round_up(n, m):
    return ((n + m - 1) // m) * m


@functools.lru_cache(maxsize=None)
def _device_kind():
    try:
        return jax.devices()[0].device_kind.lower()
    except Exception:
        return ""


def _num_tensorcores_per_chip():
    k = _device_kind()
    # v7x exposes 2 TensorCores per chip; earlier generations expose 1.
    return 2 if ("v7" in k or "7x" in k) else 1


def _mxu_width():
    k = _device_kind()
    if not k or any(v in k for v in ("v2", "v3", "v4", "v5")):
        return 128
    return 256       # v6e / v7x: 2x256^2 MXU


def _feature_pad(n):
    p = _round_up(n, _LANE)
    mxu = _mxu_width()
    if mxu > _LANE and n >= mxu:
        p = _round_up(n, mxu)   # keep genuinely-wide layers at full-MXU multiples
    return p


# ----------------------------------------------------------------------------
# Kernels: fused 3-layer MLP on one row tile.  bf16 MXU matmuls, f32 accum,
# bias/ReLU epilogue on the VPU.
# ----------------------------------------------------------------------------
def _mlp_kernel_folded(x_ref, w1_ref, b1_ref, w2_ref, w3_ref, o_ref):
    # Biases of layers 2/3 are folded into w2/w3 via a carry-one hidden column;
    # only layer 1's bias needs an explicit VALU add (x has no ones column).
    x = x_ref[...].astype(jnp.bfloat16)            # cast on VPU, hidden by DMA/MXU
    h = jnp.dot(x, w1_ref[...], preferred_element_type=jnp.float32)
    h = jnp.maximum(h + b1_ref[...], 0.0).astype(jnp.bfloat16)
    h = jnp.dot(h, w2_ref[...], preferred_element_type=jnp.float32)
    h = jnp.maximum(h, 0.0).astype(jnp.bfloat16)
    h = jnp.dot(h, w3_ref[...], preferred_element_type=jnp.float32)
    o_ref[...] = h.astype(o_ref.dtype)


def _mlp_kernel_biased(x_ref, w1_ref, b1_ref, w2_ref, b2_ref, w3_ref, b3_ref,
                       o_ref):
    x = x_ref[...].astype(jnp.bfloat16)
    h = jnp.dot(x, w1_ref[...], preferred_element_type=jnp.float32)
    h = jnp.maximum(h + b1_ref[...], 0.0).astype(jnp.bfloat16)
    h = jnp.dot(h, w2_ref[...], preferred_element_type=jnp.float32)
    h = jnp.maximum(h + b2_ref[...], 0.0).astype(jnp.bfloat16)
    h = jnp.dot(h, w3_ref[...], preferred_element_type=jnp.float32)
    o_ref[...] = (h + b3_ref[...]).astype(o_ref.dtype)


# ----------------------------------------------------------------------------
# One-time parameter preparation (outside the per-call jit).
# ----------------------------------------------------------------------------
def prepare_mlp_params(w1, b1, w2, b2, w3, b3):
    """Pad/cast weights once.  Weights are (in, out) = torch Linear.weight.T.

    Returns (params_tuple, fold_bias).  When the hidden dim has a spare padded
    column (nh < nh_p), biases of layers 2 and 3 are folded into w2/w3 via a
    carry-one column, so the kernel only does an explicit add for b1.
    Zero-padded rows/columns are numerically inert (ReLU(0)=0, zero weight
    rows contribute nothing downstream).
    """
    ninput, nh = w1.shape
    noutput = w3.shape[1]
    nh_p, nout_p = _feature_pad(nh), _feature_pad(noutput)
    fold_bias = nh_p > nh

    w1p = jnp.zeros((ninput, nh_p), jnp.bfloat16).at[:, :nh].set(
        w1.astype(jnp.bfloat16))
    b1p = jnp.zeros((1, nh_p), jnp.float32).at[:, :nh].set(
        b1.reshape(1, -1).astype(jnp.float32))
    w2p = jnp.zeros((nh_p, nh_p), jnp.bfloat16).at[:nh, :nh].set(
        w2.astype(jnp.bfloat16))
    w3p = jnp.zeros((nh_p, nout_p), jnp.bfloat16).at[:nh, :noutput].set(
        w3.astype(jnp.bfloat16))

    if fold_bias:
        # Carry-one column at index nh: b1p makes h1[:, nh] = relu(1) = 1,
        # w2p[nh, nh] = 1 propagates it, and row nh of w2p/w3p holds b2/b3.
        b1p = b1p.at[:, nh].set(1.0)
        w2p = w2p.at[nh, :nh].set(b2.reshape(-1).astype(jnp.bfloat16))
        w2p = w2p.at[nh, nh].set(1.0)
        w3p = w3p.at[nh, :noutput].set(b3.reshape(-1).astype(jnp.bfloat16))
        return (w1p, b1p, w2p, w3p), fold_bias

    b2p = jnp.zeros((1, nh_p), jnp.float32).at[:, :nh].set(
        b2.reshape(1, -1).astype(jnp.float32))
    b3p = jnp.zeros((1, nout_p), jnp.float32).at[:, :noutput].set(
        b3.reshape(1, -1).astype(jnp.float32))
    return (w1p, b1p, w2p, b2p, w3p, b3p), fold_bias


# ----------------------------------------------------------------------------
# Forward.
# ----------------------------------------------------------------------------
@functools.partial(jax.jit, static_argnames=("noutput", "fold_bias", "tile_m"))
def mlp_forward(x, *params, noutput, fold_bias, tile_m=1024):
    if fold_bias:
        w1p, b1p, w2p, w3p = params
    else:
        w1p, b1p, w2p, b2p, w3p, b3p = params
    ninput, nh_p = w1p.shape
    nout_p = w3p.shape[1]
    lead_shape = x.shape[:-1]

    # --- flatten rows, pick a generation-aware row tile ----------------------
    x2 = x.reshape(-1, ninput)                   # h = x.view(-1, ninput)
    rows = x2.shape[0]

    tile = max(_SUBLANE, min(tile_m, _round_up(rows, _SUBLANE)))
    grid_m = -(-rows // tile)                    # ceil div (trace-time int)
    if _num_tensorcores_per_chip() > 1 and grid_m % 2 == 1 and rows > _SUBLANE:
        # v7x shards the "parallel" axis over 2 TCs: prefer an even step count
        # so neither core gets a tail tile.  Single-TC chips keep one big tile.
        grid_m += 1
        tile = max(_SUBLANE, _round_up(-(-rows // grid_m), _SUBLANE))
        grid_m = -(-rows // tile)
    rows_p = grid_m * tile

    if rows_p != rows:                           # zero row-padding, sliced off below
        x2 = jnp.zeros((rows_p, ninput), x2.dtype).at[:rows, :].set(x2)

    # --- cost hint + explicit VMEM budget ------------------------------------
    out_itemsize = jnp.dtype(x.dtype).itemsize
    param_bytes = sum(p.size * p.dtype.itemsize for p in params)
    flops = 2 * rows_p * (ninput * nh_p + nh_p * nh_p + nh_p * nout_p)
    bytes_accessed = (rows_p * ninput * x2.dtype.itemsize
                      + param_bytes
                      + rows_p * nout_p * out_itemsize)
    cost = pl.CostEstimate(flops=flops, transcendentals=0,
                           bytes_accessed=bytes_accessed)

    vmem_needed = (
        2 * tile * ninput * x2.dtype.itemsize        # x tile, double-buffered
        + 2 * tile * nout_p * out_itemsize           # out tile, double-buffered
        + 2 * param_bytes                            # resident (dbl-buffered) weights
        + 4 * tile * max(nh_p, nout_p) * 4)          # live f32/bf16 intermediates
    vmem_limit = int(min(max(2 * vmem_needed, 32 << 20), 48 << 20))

    full2d = lambda arr: pl.BlockSpec(arr.shape, lambda i: (0, 0))
    kernel = _mlp_kernel_folded if fold_bias else _mlp_kernel_biased

    out2 = pl.pallas_call(
        kernel,
        out_shape=jax.ShapeDtypeStruct((rows_p, nout_p), x.dtype),
        grid_spec=pltpu.PrefetchScalarGridSpec(
            num_scalar_prefetch=0,
            grid=(grid_m,),
            in_specs=[pl.BlockSpec((tile, ninput), lambda i: (i, 0))]
                     + [full2d(p) for p in params],
            out_specs=pl.BlockSpec((tile, nout_p), lambda i: (i, 0)),
        ),
        compiler_params=pltpu.CompilerParams(
            dimension_semantics=("parallel",),
            vmem_limit_bytes=vmem_limit),
        cost_estimate=cost,
    )(x2, *params)

    # slice off row/column padding, then h = h.view(*x.shape[:-1], -1)
    out = out2[:rows, :noutput]
    return out.reshape(*lead_shape, noutput)


def _reference(x, w1, b1, w2, b2, w3, b3):
    h = x.reshape(-1, w1.shape[0]).astype(jnp.float32)
    h = jnp.maximum(h @ w1 + b1.reshape(1, -1), 0.0)
    h = jnp.maximum(h @ w2 + b2.reshape(1, -1), 0.0)
    h = h @ w3 + b3.reshape(1, -1)
    return h.reshape(*x.shape[:-1], w3.shape[1]).astype(x.dtype)


if __name__ == "__main__":
    # MLP(ninput=32, nh=64, noutput=16, nlayers=3)
    ninput, nh, noutput = 32, 64, 16

    key = jax.random.PRNGKey(0)
    kx, k1, k2, k3, kb1, kb2, kb3 = jax.random.split(key, 7)

    # input: [2, 8, 8, 32] -> flattened rows = 128
    x = jax.random.normal(kx, (2, 8, 8, ninput), dtype=jnp.float32)

    # parameters stored as (in, out) -- transpose of torch Linear.weight
    w1 = jax.random.normal(k1, (ninput, nh), dtype=jnp.float32) * 0.1
    b1 = jax.random.normal(kb1, (nh,), dtype=jnp.float32) * 0.1
    w2 = jax.random.normal(k2, (nh, nh), dtype=jnp.float32) * 0.1
    b2 = jax.random.normal(kb2, (nh,), dtype=jnp.float32) * 0.1
    w3 = jax.random.normal(k3, (nh, noutput), dtype=jnp.float32) * 0.1
    b3 = jax.random.normal(kb3, (noutput,), dtype=jnp.float32) * 0.1

    # one-time pad/cast (hoisted out of the per-call jit)
    params, fold = prepare_mlp_params(w1, b1, w2, b2, w3, b3)

    out = mlp_forward(x, *params, noutput=noutput, fold_bias=fold, tile_m=1024)
    out = jax.block_until_ready(out)

    ref = _reference(x, w1, b1, w2, b2, w3, b3)
    assert out.shape == (2, 8, 8, noutput), out.shape
    # bf16 MXU inputs -> small drift vs the f32 reference
    assert jnp.allclose(out, ref, atol=5e-2, rtol=5e-2), "mismatch vs reference"

    print("KERNEL_OK")
</pallas_src>

<mosaic_0001>
module attributes {stable_mosaic.version = 11 : i64} {
  func.func @_mlp_kernel_folded(%arg0: i32, %arg1: memref<128x32xf32, #tpu.memory_space<vmem>>, %arg2: memref<32x128xbf16, #tpu.memory_space<vmem>>, %arg3: memref<1x128xf32, #tpu.memory_space<vmem>>, %arg4: memref<128x128xbf16, #tpu.memory_space<vmem>>, %arg5: memref<128x128xbf16, #tpu.memory_space<vmem>>, %arg6: memref<128x128xf32, #tpu.memory_space<vmem>>) attributes {dimension_semantics = [#tpu.dimension_semantics<parallel>], iteration_bounds = array<i64: 1>, scalar_prefetch = 0 : i64, scratch_operands = 0 : i64, tpu.core_type = #tpu.core_type<tc>, window_params = [{transform_indices = @transform_0, window_bounds = array<i64: 128, 32>}, {pipeline_mode = #tpu.pipeline_mode<synchronous>, transform_indices = @transform_1, window_bounds = array<i64: 32, 128>}, {pipeline_mode = #tpu.pipeline_mode<synchronous>, transform_indices = @transform_2, window_bounds = array<i64: 1, 128>}, {pipeline_mode = #tpu.pipeline_mode<synchronous>, transform_indices = @transform_3, window_bounds = array<i64: 128, 128>}, {pipeline_mode = #tpu.pipeline_mode<synchronous>, transform_indices = @transform_4, window_bounds = array<i64: 128, 128>}, {transform_indices = @transform_5, window_bounds = array<i64: 128, 128>}]} {
    %c0 = arith.constant 0 : index
    %c0_0 = arith.constant 0 : index
    %0 = vector.load %arg1[%c0, %c0_0] : memref<128x32xf32, #tpu.memory_space<vmem>>, vector<128x32xf32>
    %1 = arith.truncf %0 : vector<128x32xf32> to vector<128x32xbf16>
    %c0_1 = arith.constant 0 : index
    %c0_2 = arith.constant 0 : index
    %2 = vector.load %arg2[%c0_1, %c0_2] : memref<32x128xbf16, #tpu.memory_space<vmem>>, vector<32x128xbf16>
    %cst = arith.constant dense<0.000000e+00> : vector<128x128xf32>
    %3 = tpu.matmul %1, %2, %cst {dimension_numbers = #tpu.dot_dimension_numbers<[1], [0], [0], [1], [0, 0, 1, 1], [], []>} : vector<128x32xbf16>, vector<32x128xbf16>, vector<128x128xf32> -> vector<128x128xf32>
    %c0_3 = arith.constant 0 : index
    %c0_4 = arith.constant 0 : index
    %4 = vector.load %arg3[%c0_3, %c0_4] : memref<1x128xf32, #tpu.memory_space<vmem>>, vector<1x128xf32>
    %5 = vector.broadcast %4 : vector<1x128xf32> to vector<128x128xf32>
    %6 = arith.addf %3, %5 : vector<128x128xf32>
    %cst_5 = arith.constant 0.000000e+00 : f32
    %7 = vector.broadcast %cst_5 : f32 to vector<128x128xf32>
    %8 = arith.maximumf %6, %7 : vector<128x128xf32>
    %9 = arith.truncf %8 : vector<128x128xf32> to vector<128x128xbf16>
    %c0_6 = arith.constant 0 : index
    %c0_7 = arith.constant 0 : index
    %10 = vector.load %arg4[%c0_6, %c0_7] : memref<128x128xbf16, #tpu.memory_space<vmem>>, vector<128x128xbf16>
    %cst_8 = arith.constant dense<0.000000e+00> : vector<128x128xf32>
    %11 = tpu.matmul %9, %10, %cst_8 {dimension_numbers = #tpu.dot_dimension_numbers<[1], [0], [0], [1], [0, 0, 1, 1], [], []>} : vector<128x128xbf16>, vector<128x128xbf16>, vector<128x128xf32> -> vector<128x128xf32>
    %cst_9 = arith.constant 0.000000e+00 : f32
    %12 = vector.broadcast %cst_9 : f32 to vector<128x128xf32>
    %13 = arith.maximumf %11, %12 : vector<128x128xf32>
    %14 = arith.truncf %13 : vector<128x128xf32> to vector<128x128xbf16>
    %c0_10 = arith.constant 0 : index
    %c0_11 = arith.constant 0 : index
    %15 = vector.load %arg5[%c0_10, %c0_11] : memref<128x128xbf16, #tpu.memory_space<vmem>>, vector<128x128xbf16>
    %cst_12 = arith.constant dense<0.000000e+00> : vector<128x128xf32>
    %16 = tpu.matmul %14, %15, %cst_12 {dimension_numbers = #tpu.dot_dimension_numbers<[1], [0], [0], [1], [0, 0, 1, 1], [], []>} : vector<128x128xbf16>, vector<128x128xbf16>, vector<128x128xf32> -> vector<128x128xf32>
    %c0_13 = arith.constant 0 : index
    %c0_14 = arith.constant 0 : index
    %17 = vector.load %arg6[%c0_13, %c0_14] : memref<128x128xf32, #tpu.memory_space<vmem>>, vector<128x128xf32>
    tpu.vector_store %arg6[%c0_13, %c0_14], %16 {strides = array<i32>} : memref<128x128xf32, #tpu.memory_space<vmem>>, vector<128x128xf32>,
    return
  }
  func.func @transform_0(%arg0: i32) -> (i32, i32) {
    %c0_i32 = arith.constant 0 : i32
    %c0_i32_0 = arith.constant 0 : i32
    return %arg0, %c0_i32 : i32, i32
  }
  func.func @transform_1(%arg0: i32) -> (i32, i32) {
    %c0_i32 = arith.constant 0 : i32
    %c0_i32_0 = arith.constant 0 : i32
    %c0_i32_1 = arith.constant 0 : i32
    return %c0_i32, %c0_i32_0 : i32, i32
  }
  func.func @transform_2(%arg0: i32) -> (i32, i32) {
    %c0_i32 = arith.constant 0 : i32
    %c0_i32_0 = arith.constant 0 : i32
    %c0_i32_1 = arith.constant 0 : i32
    return %c0_i32, %c0_i32_0 : i32, i32
  }
  func.func @transform_3(%arg0: i32) -> (i32, i32) {
    %c0_i32 = arith.constant 0 : i32
    %c0_i32_0 = arith.constant 0 : i32
    %c0_i32_1 = arith.constant 0 : i32
    return %c0_i32, %c0_i32_0 : i32, i32
  }
  func.func @transform_4(%arg0: i32) -> (i32, i32) {
    %c0_i32 = arith.constant 0 : i32
    %c0_i32_0 = arith.constant 0 : i32
    %c0_i32_1 = arith.constant 0 : i32
    return %c0_i32, %c0_i32_0 : i32, i32
  }
  func.func @transform_5(%arg0: i32) -> (i32, i32) {
    %c0_i32 = arith.constant 0 : i32
    %c0_i32_0 = arith.constant 0 : i32
    return %arg0, %c0_i32 : i32, i32
  }
}

</mosaic_0001>

<bundles_post_ra>
// kernel: mlp_forward.1
= control target key start
LH: loop header
LB: loop body
LE: loop exit
PB: predicated region body
PF: predicated region fallthrough
CT: control target
= control target key end

     0   :  { %10 = vsyncpa [#allocation3], 0  ;;  %s1081_s0 = inlined_call_operand.hbm [shape: f32[128,32], index: 0, kind: input, shape index: {}]   ;;  %s1082_s1 = inlined_call_operand.hbm [shape: bf16[32,128], index: 1, kind: input, shape index: {}]   ;;  %s1083_s2 = inlined_call_operand.vmem [shape: f32[1,128], index: 2, kind: input, shape index: {}]   ;;  %s1084_s3 = inlined_call_operand.hbm [shape: bf16[128,128], index: 3, kind: input, shape index: {}]   ;;  %s1085_s4 = inlined_call_operand.hbm [shape: bf16[128,128], index: 4, kind: input, shape index: {}]   ;;  %s1086_s5 = inlined_call_operand.hbm [shape: f32[128,128], index: 5, kind: output, shape index: {}]  }
   0x1   :  { %11 = vsyncpa [#allocation6], 0 }
   0x2   :  { %12 = vsyncpa [#allocation9], 0 }
   0x3   :  { %13 = vsyncpa [#allocation4], 0  ;;  %s949_s18 = smov [#allocation5]   ;;  %s831_s22 = scalar_lea.hbm %s1082_s1, 256 }
   0x4   :  { %s31_s19 = sshll.u32 %s949_s18, 4  ;;  %p832_p0 = scmp.ne.s32.totalorder %s1082_s1, %s831_s22  ;;  %s32_s19 = int_to_ptr.vmem [resolvable:$true] %s31_s19 }
   0x5   :  { %p835_p1 = scmp.lt.u32.totalorder %s831_s22, %s1082_s1 }
   0x7   :  { %p837_p2 = pnand %p835_p1, %p832_p0 }
   0x9   :  { %840 = shalt.err (!%p837_p2)
}
   0xa   :  { %s841_s27 = scalar_lea.vmem %s32_s19, 256  ;;  %p846_p4 = scmp.lt.s32.totalorder %s32_s19, %s32_s19 }
   0xb   :  { %p842_p3 = scmp.ne.s32.totalorder %s32_s19, %s841_s27  ;;  %p847_p5 = scmp.lt.s32.totalorder %s841_s27, %s841_s27 }
   0xd   :  { %p848_p6 = por %p847_p5, %p846_p4 }
   0xf   :  { %p849_p7 = pnand %p848_p6, %p842_p3 }
  0x11   :  { %852 = shalt.err (!%p849_p7)
}
  0x12   :  { %s950_s28 = smov 64   ;;  %s951_s29 = smov 4  }
  0x13   :  { %37 = dma.hbm_to_vmem [thread:$0]  %s1082_s1, 256, %s32_s19, [#allocation6], %s950_s28, %s950_s28, %s951_s29  }
  0x14   :  { %s952_s7 = smov [#allocation2]   ;;  %s853_s11 = scalar_lea.hbm %s1081_s0, 2048 }
  0x15   :  { %s19_s8 = sshll.u32 %s952_s7, 4  ;;  %p854_p8 = scmp.ne.s32.totalorder %s1081_s0, %s853_s11  ;;  %s20_s8 = int_to_ptr.vmem [resolvable:$true] %s19_s8 }
  0x16   :  { %p857_p9 = scmp.lt.u32.totalorder %s853_s11, %s1081_s0 }
  0x18   :  { %p859_p10 = pnand %p857_p9, %p854_p8 }
  0x1a   :  { %862 = shalt.err (!%p859_p10)
}
  0x1b   :  { %s863_s16 = scalar_lea.vmem %s20_s8, 2048  ;;  %p868_p12 = scmp.lt.s32.totalorder %s20_s8, %s20_s8 }
  0x1c   :  { %p864_p11 = scmp.ne.s32.totalorder %s20_s8, %s863_s16  ;;  %p869_p13 = scmp.lt.s32.totalorder %s863_s16, %s863_s16 }
  0x1e   :  { %p870_p0 = por %p869_p13, %p868_p12 }
  0x20   :  { %p871_p1 = pnand %p870_p0, %p864_p11 }
  0x22   :  { %874 = shalt.err (!%p871_p1)
}
  0x23   :  { %s953_s1 = smov 128   ;;  %s954_s17 = smov 8  }
  0x24   :  { %25 = dma.hbm_to_vmem [thread:$0]  %s1081_s0, 2048, %s20_s8, [#allocation3], %s953_s1, %s953_s1, %s954_s17  }
  0x25   :  { %s955_s20 = smov [#allocation7]   ;;  %s956_s22 = smov [#allocation8]  }
  0x26   :  { %s45_s21 = sshll.u32 %s955_s20, 4  ;;  %s57_s23 = sshll.u32 %s956_s22, 4  ;;  %s46_s21 = int_to_ptr.vmem [resolvable:$true] %s45_s21  ;;  %s1018_s23 = int_to_ptr.vmem [resolvable:$true] %s57_s23 }
  0x27   :  { %s875_s26 = scalar_lea.hbm %s1084_s3, 1024 }
  0x28   :  { %p876_p2 = scmp.ne.s32.totalorder %s1084_s3, %s875_s26  ;;  %p879_p3 = scmp.lt.u32.totalorder %s875_s26, %s1084_s3 }
  0x2a   :  { %p881_p4 = pnand %p879_p3, %p876_p2 }
  0x2c   :  { %884 = shalt.err (!%p881_p4)
}
  0x2d   :  { %s885_s0 = scalar_lea.vmem %s46_s21, 1024  ;;  %p890_p6 = scmp.lt.s32.totalorder %s46_s21, %s46_s21 }
  0x2e   :  { %p886_p5 = scmp.ne.s32.totalorder %s46_s21, %s885_s0  ;;  %p891_p7 = scmp.lt.s32.totalorder %s885_s0, %s885_s0 }
  0x30   :  { %p892_p8 = por %p891_p7, %p890_p6 }
  0x32   :  { %p893_p9 = pnand %p892_p8, %p886_p5 }
  0x34   :  { %896 = shalt.err (!%p893_p9)
}
  0x35   :  { %51 = dma.hbm_to_vmem [thread:$0]  %s1084_s3, 1024, %s46_s21, [#allocation6], %s950_s28, %s950_s28, %s951_s29  }
  0x36   :  { %s897_s12 = scalar_lea.hbm %s1085_s4, 1024 }
  0x37   :  { %p898_p10 = scmp.ne.s32.totalorder %s1085_s4, %s897_s12  ;;  %p901_p11 = scmp.lt.u32.totalorder %s897_s12, %s1085_s4 }
  0x39   :  { %p903_p12 = pnand %p901_p11, %p898_p10 }
  0x3b   :  { %906 = shalt.err (!%p903_p12)
}
  0x3c   :  { %s907_s18 = scalar_lea.vmem %s1018_s23, 1024  ;;  %p912_p0 = scmp.lt.s32.totalorder %s1018_s23, %s1018_s23 }
  0x3d   :  { %p908_p13 = scmp.ne.s32.totalorder %s1018_s23, %s907_s18  ;;  %p913_p1 = scmp.lt.s32.totalorder %s907_s18, %s907_s18 }
  0x3f   :  { %p914_p2 = por %p913_p1, %p912_p0 }
  0x41   :  { %p915_p3 = pnand %p914_p2, %p908_p13 }
  0x43   :  { %918 = shalt.err (!%p915_p3)
}
  0x44   :  { %63 = dma.hbm_to_vmem [thread:$0]  %s1085_s4, 1024, %s1018_s23, [#allocation9], %s950_s28, %s950_s28, %s951_s29  }
  0x45   :  { %941 = dma.done.wait [#allocation3], 2048  }
  0x46   :  { %942 = vsyncadd [#allocation3], 4294965248 }
  0x47   :  { %943 = dma.done.wait [#allocation6], 1280  }
  0x48   :  { %944 = vsyncadd [#allocation6], 4294966016 }
  0x49   :  { %945 = dma.done.wait [#allocation9], 1024  }
  0x4a   :  { %946 = vsyncadd [#allocation9], 4294966272  ;;  %v813_v0 = vld [vmem:[#allocation5] sm:$0xff]   ;;  %v814_v1 = vld [vmem:[#allocation5 + $0x8] sm:$0xff]   ;;  %vm124_vm0 = vcmask 261120  }
  0x4b   :  { %720 = vmatprep.subr.bf16.mxu0 %v813_v0  ;;  %v77_v2 = vld [vmem:[#allocation2] sm:$0xff]  ;;  %v78_v3 = vld [vmem:[#allocation2 + $0x8] sm:$0xff]  ;;  %v79_v5 = vld [vmem:[#allocation2 + $0x10] sm:$0xff] }
  0x4c   :  { %721 = vmatpush3.bf16.msra.mxu0 %v813_v0  ;;  %v93_v4 = vpack.c.bf16 %v78_v3, %v77_v2  ;;  %v80_v6 = vld [vmem:[#allocation2 + $0x18] sm:$0xff]  ;;  %v81_v7 = vld [vmem:[#allocation2 + $0x20] sm:$0xff]  ;;  %v82_v8 = vld [vmem:[#allocation2 + $0x28] sm:$0xff] }
  0x4d   :  { %722 = vmatprep.subr.bf16.mxu0 %v814_v1  ;;  %v94_v9 = vpack.c.bf16 %v80_v6, %v79_v5  ;;  %v95_v10 = vpack.c.bf16 %v82_v8, %v81_v7  ;;  %v815_v11 = vld [vmem:[#allocation7] sm:$0xff]   ;;  %v84_v13 = vld [vmem:[#allocation2 + $0x38] sm:$0xff]  ;;  %v85_v15 = vld [vmem:[#allocation2 + $0x40] sm:$0xff] }
  0x4e   :  { %724 = vmatprep.mubr.msk.bf16.mxu0 %vm124_vm0, %v93_v4  ;;  %v83_v12 = vld [vmem:[#allocation2 + $0x30] sm:$0xff]  ;;  %v816_v14 = vld [vmem:[#allocation7 + $0x8] sm:$0xff]   ;;  %740 = vmatprep.subr.bf16.mxu1 %v815_v11  ;;  %v86_v16 = vld [vmem:[#allocation2 + $0x48] sm:$0xff] }
  0x4f   :  { %741 = vmatpush3.bf16.msra.mxu1 %v815_v11  ;;  %v817_v17 = vld [vmem:[#allocation7 + $0x10] sm:$0xff]   ;;  %v96_v18 = vpack.c.bf16 %v84_v13, %v83_v12  ;;  %v818_v19 = vld [vmem:[#allocation7 + $0x18] sm:$0xff]   ;;  %v97_v20 = vpack.c.bf16 %v86_v16, %v85_v15  ;;  %v87_v21 = vld [vmem:[#allocation2 + $0x50] sm:$0xff] }
  0x50   :  { %723 = vmatpush3.bf16.msra.mxu0 %v814_v1  ;;  %742 = vmatprep.subr.bf16.mxu1 %v816_v14  ;;  %v88_v22 = vld [vmem:[#allocation2 + $0x58] sm:$0xff]  ;;  %v89_v23 = vld [vmem:[#allocation2 + $0x60] sm:$0xff]  ;;  %v90_v24 = vld [vmem:[#allocation2 + $0x68] sm:$0xff] }
  0x51   :  { %v819_v25 = vld [vmem:[#allocation7 + $0x20] sm:$0xff]   ;;  %v98_v26 = vpack.c.bf16 %v88_v22, %v87_v21  ;;  %v99_v27 = vpack.c.bf16 %v90_v24, %v89_v23  ;;  %v820_v28 = vld [vmem:[#allocation7 + $0x28] sm:$0xff]   ;;  %v821_v32 = vld [vmem:[#allocation7 + $0x30] sm:$0xff]  }
  0x52   :  { %v91_v29 = vld [vmem:[#allocation2 + $0x70] sm:$0xff]  ;;  %v92_v30 = vld [vmem:[#allocation2 + $0x78] sm:$0xff]  ;;  %v822_v33 = vld [vmem:[#allocation7 + $0x38] sm:$0xff]  }
  0x53   :  { %725 = vmatmul.mubr.msk.bf16.vlgmr.msra.gmra.mrb[0].mxu0 %vm124_vm0, %v94_v9  ;;  %743 = vmatpush3.bf16.msra.mxu1 %v816_v14  ;;  %v100_v31 = vpack.c.bf16 %v92_v30, %v91_v29  ;;  %v823_v34 = vld [vmem:[#allocation8] sm:$0xff]   ;;  %v824_v35 = vld [vmem:[#allocation8 + $0x8] sm:$0xff]   ;;  %v825_v36 = vld [vmem:[#allocation8 + $0x10] sm:$0xff]  }
  0x54   :  { %728 = vmatprep.mubr.msk.bf16.mxu0 %vm124_vm0, %v95_v10  ;;  %744 = vmatprep.subr.bf16.mxu1 %v817_v17  ;;  %v826_v37 = vld [vmem:[#allocation8 + $0x18] sm:$0xff]   ;;  %v827_v38 = vld [vmem:[#allocation8 + $0x20] sm:$0xff]   ;;  %v828_v39 = vld [vmem:[#allocation8 + $0x28] sm:$0xff]  }
  0x55   :  { %772 = vmatprep.subr.bf16.mxu0 %v823_v34  ;;  %v651_v40 = vld [vmem:[%s1083_s2] ss:$0 sm:$0xff]  ;;  %s957_s2 = smov [#allocation10]  }
  0x56   :  { %773 = vmatpush3.bf16.msra.mxu0 %v823_v34  ;;  %v830_v34 = vld [vmem:[#allocation8 + $0x38] sm:$0xff]   ;;  %s637_s29 = sshll.u32 %s957_s2, 4  ;;  %s638_s29 = int_to_ptr.vmem [resolvable:$true] %s637_s29 }
  0x57   :  { %745 = vmatpush3.bf16.msra.mxu1 %v817_v17  ;;  %774 = vmatprep.subr.bf16.mxu0 %v824_v35  ;;  %s919_s20 = scalar_lea.vmem %s638_s29, 2048  ;;  %p924_p5 = scmp.lt.s32.totalorder %s638_s29, %s638_s29 }
  0x58   :  { %746 = vmatprep.subr.bf16.mxu1 %v818_v19  ;;  %p920_p4 = scmp.ne.s32.totalorder %s638_s29, %s919_s20  ;;  %p925_p6 = scmp.lt.s32.totalorder %s919_s20, %s919_s20 }
  0x5a   :  { %775 = vmatpush3.bf16.msra.mxu0 %v824_v35  ;;  %p926_p7 = por %p925_p6, %p924_p5 }
  0x5b   :  { %729 = vmatmul.mubr.msk.bf16.gmra.mrb[4].mxu0 %vm124_vm0, %v96_v18  ;;  %747 = vmatpush3.bf16.msra.mxu1 %v818_v19 }
  0x5c   :  { %732 = vmatprep.mubr.msk.bf16.mxu0 %vm124_vm0, %v97_v20  ;;  %748 = vmatprep.subr.bf16.mxu1 %v819_v25  ;;  %p927_p8 = pnand %p926_p7, %p920_p4 }
  0x5d   :  { %776 = vmatprep.subr.bf16.mxu0 %v825_v36 }
  0x5e   :  { %777 = vmatpush3.bf16.msra.mxu0 %v825_v36 }
  0x5f   :  { %749 = vmatpush3.bf16.msra.mxu1 %v819_v25  ;;  %778 = vmatprep.subr.bf16.mxu0 %v826_v37 }
  0x60   :  { %750 = vmatprep.subr.bf16.mxu1 %v820_v28 }
  0x62   :  { %779 = vmatpush3.bf16.msra.mxu0 %v826_v37 }
  0x63   :  { %733 = vmatmul.mubr.msk.bf16.gmra.mrb[8].mxu0 %vm124_vm0, %v98_v26  ;;  %751 = vmatpush3.bf16.msra.mxu1 %v820_v28 }
  0x64   :  { %736 = vmatprep.mubr.msk.bf16.mxu0 %vm124_vm0, %v99_v27  ;;  %752 = vmatprep.subr.bf16.mxu1 %v821_v32 }
  0x65   :  { %780 = vmatprep.subr.bf16.mxu0 %v827_v38 }
  0x66   :  { %781 = vmatpush3.bf16.msra.mxu0 %v827_v38 }
  0x67   :  { %753 = vmatpush3.bf16.msra.mxu1 %v821_v32  ;;  %782 = vmatprep.subr.bf16.mxu0 %v828_v39 }
  0x68   :  { %754 = vmatprep.subr.bf16.mxu1 %v822_v33 }
  0x6a   :  { %783 = vmatpush3.bf16.msra.mxu0 %v828_v39 }
  0x6b   :  { %737 = vmatmul.mubr.msk.bf16.gmra.mrb[12].mxu0 %vm124_vm0, %v100_v31  ;;  %755 = vmatpush3.bf16.msra.mxu1 %v822_v33  ;;  %v829_v33 = vld [vmem:[#allocation8 + $0x30] sm:$0xff]  }
  0x6c   :  { %784 = vmatprep.subr.bf16.mxu0 %v829_v33 }
  0x6e   :  { %785 = vmatpush3.bf16.msra.mxu0 %v829_v33 }
  0x6f   :  { %786 = vmatprep.subr.bf16.mxu0 %v830_v34 }
  0x72   :  { %787 = vmatpush3.bf16.msra.mxu0 %v830_v34 }
 0x126   :  { %v726_v41 = vpop.f32.mrb[0].mxu0 }
 0x127   :  { %v192_v42 = vadd.f32 %v726_v41, %v651_v40  ;;  %v183_v43 = vpop.f32.mrb[1].mxu0 }
 0x128   :  { %v184_v44 = vadd.f32 %v651_v40, %v183_v43  ;;  %v727_v45 = vpop.f32.mrb[2].mxu0 }
 0x129   :  { %v195_v46 = vadd.f32 %v727_v45, %v651_v40  ;;  %v186_v47 = vpop.f32.mrb[3].mxu0  ;;  %v248_v49 = vmax.f32 %v192_v42, 0.0 }
 0x12a   :  { %v187_v48 = vadd.f32 %v651_v40, %v186_v47  ;;  %v246_v51 = vmax.f32 %v184_v44, 0.0 }
 0x12b   :  { %v249_v50 = vmax.f32 %v195_v46, 0.0 }
 0x12c   :  { %v247_v52 = vmax.f32 %v187_v48, 0.0 }
 0x12d   :  { %v263_v53 = vpack.c.bf16 %v249_v50, %v248_v49 }
 0x12e   :  { %v730_v54 = vpop.f32.mrb[4].mxu0  ;;  %v262_v55 = vpack.c.bf16 %v247_v52, %v246_v51 }
 0x12f   :  { %v208_v56 = vadd.f32 %v730_v54, %v651_v40  ;;  %v199_v57 = vpop.f32.mrb[5].mxu0 }
 0x130   :  { %v200_v58 = vadd.f32 %v651_v40, %v199_v57  ;;  %v731_v59 = vpop.f32.mrb[6].mxu0  ;;  %756 = vmatprep.mubr.bf16.mxu1 %v262_v55 }
 0x131   :  { %v211_v60 = vadd.f32 %v731_v59, %v651_v40  ;;  %v202_v61 = vpop.f32.mrb[7].mxu0  ;;  %757 = vmatmul.mubr.bf16.vlgmr.msra.gmra.mrb[0].mxu1 %v263_v53  ;;  %v252_v63 = vmax.f32 %v208_v56, 0.0 }
 0x132   :  { %v203_v62 = vadd.f32 %v651_v40, %v202_v61  ;;  %v250_v1 = vmax.f32 %v200_v58, 0.0 }
 0x133   :  { %v253_v0 = vmax.f32 %v211_v60, 0.0 }
 0x134   :  { %v251_v2 = vmax.f32 %v203_v62, 0.0 }
 0x135   :  { %v265_v3 = vpack.c.bf16 %v253_v0, %v252_v63 }
 0x136   :  { %v264_v4 = vpack.c.bf16 %v251_v2, %v250_v1  ;;  %v734_v5 = vpop.f32.mrb[8].mxu0 }
 0x137   :  { %v224_v6 = vadd.f32 %v734_v5, %v651_v40  ;;  %v215_v7 = vpop.f32.mrb[9].mxu0 }
 0x138   :  { %v216_v8 = vadd.f32 %v651_v40, %v215_v7  ;;  %v735_v9 = vpop.f32.mrb[10].mxu0  ;;  %760 = vmatprep.mubr.bf16.mxu1 %v264_v4 }
 0x139   :  { %v227_v10 = vadd.f32 %v735_v9, %v651_v40  ;;  %v218_v11 = vpop.f32.mrb[11].mxu0  ;;  %761 = vmatmul.mubr.bf16.gmra.mrb[4].mxu1 %v265_v3  ;;  %v256_v13 = vmax.f32 %v224_v6, 0.0 }
 0x13a   :  { %v219_v12 = vadd.f32 %v651_v40, %v218_v11  ;;  %v254_v15 = vmax.f32 %v216_v8, 0.0 }
 0x13b   :  { %v257_v14 = vmax.f32 %v227_v10, 0.0 }
 0x13c   :  { %v255_v16 = vmax.f32 %v219_v12, 0.0 }
 0x13d   :  { %v267_v17 = vpack.c.bf16 %v257_v14, %v256_v13 }
 0x13e   :  { %v266_v18 = vpack.c.bf16 %v255_v16, %v254_v15  ;;  %v738_v19 = vpop.f32.mrb[12].mxu0 }
 0x13f   :  { %v240_v20 = vadd.f32 %v738_v19, %v651_v40  ;;  %v231_v21 = vpop.f32.mrb[13].mxu0 }
 0x140   :  { %v232_v22 = vadd.f32 %v651_v40, %v231_v21  ;;  %v739_v23 = vpop.f32.mrb[14].mxu0  ;;  %764 = vmatprep.mubr.bf16.mxu1 %v266_v18 }
 0x141   :  { %v243_v24 = vadd.f32 %v739_v23, %v651_v40  ;;  %v234_v25 = vpop.f32.mrb[15].mxu0  ;;  %765 = vmatmul.mubr.bf16.gmra.mrb[8].mxu1 %v267_v17  ;;  %v260_v27 = vmax.f32 %v240_v20, 0.0 }
 0x142   :  { %v235_v26 = vadd.f32 %v651_v40, %v234_v25  ;;  %v258_v29 = vmax.f32 %v232_v22, 0.0 }
 0x143   :  { %v261_v28 = vmax.f32 %v243_v24, 0.0 }
 0x144   :  { %v259_v30 = vmax.f32 %v235_v26, 0.0 }
 0x145   :  { %v269_v31 = vpack.c.bf16 %v261_v28, %v260_v27 }
 0x146   :  { %v268_v32 = vpack.c.bf16 %v259_v30, %v258_v29 }
 0x148   :  { %768 = vmatprep.mubr.bf16.mxu1 %v268_v32 }
 0x149   :  { %769 = vmatmul.mubr.bf16.gmra.mrb[12].mxu1 %v269_v31 }
 0x204   :  { %v758_v35 = vpop.f32.mrb[0].mxu1 }
 0x205   :  { %v368_v36 = vpop.f32.mrb[1].mxu1  ;;  %v433_v38 = vmax.f32 %v758_v35, 0.0 }
 0x206   :  { %v759_v37 = vpop.f32.mrb[2].mxu1  ;;  %v431_v41 = vmax.f32 %v368_v36, 0.0 }
 0x207   :  { %v434_v39 = vmax.f32 %v759_v37, 0.0  ;;  %v371_v40 = vpop.f32.mrb[3].mxu1 }
 0x208   :  { %v432_v42 = vmax.f32 %v371_v40, 0.0 }
 0x209   :  { %v448_v43 = vpack.c.bf16 %v434_v39, %v433_v38 }
 0x20a   :  { %v447_v44 = vpack.c.bf16 %v432_v42, %v431_v41 }
 0x20c   :  { %v762_v45 = vpop.f32.mrb[4].mxu1  ;;  %788 = vmatprep.mubr.bf16.mxu0 %v447_v44 }
 0x20d   :  { %v384_v46 = vpop.f32.mrb[5].mxu1  ;;  %789 = vmatmul.mubr.bf16.vlgmr.msra.gmra.mrb[16].mxu0 %v448_v43  ;;  %v437_v48 = vmax.f32 %v762_v45, 0.0 }
 0x20e   :  { %v763_v47 = vpop.f32.mrb[6].mxu1  ;;  %v435_v51 = vmax.f32 %v384_v46, 0.0 }
 0x20f   :  { %v438_v49 = vmax.f32 %v763_v47, 0.0  ;;  %v387_v50 = vpop.f32.mrb[7].mxu1 }
 0x210   :  { %v436_v52 = vmax.f32 %v387_v50, 0.0 }
 0x211   :  { %v450_v53 = vpack.c.bf16 %v438_v49, %v437_v48 }
 0x212   :  { %v449_v54 = vpack.c.bf16 %v436_v52, %v435_v51 }
 0x214   :  { %v766_v55 = vpop.f32.mrb[8].mxu1  ;;  %792 = vmatprep.mubr.bf16.mxu0 %v449_v54 }
 0x215   :  { %v400_v56 = vpop.f32.mrb[9].mxu1  ;;  %793 = vmatmul.mubr.bf16.gmra.mrb[20].mxu0 %v450_v53  ;;  %v441_v58 = vmax.f32 %v766_v55, 0.0 }
 0x216   :  { %v767_v57 = vpop.f32.mrb[10].mxu1  ;;  %v439_v61 = vmax.f32 %v400_v56, 0.0 }
 0x217   :  { %v442_v59 = vmax.f32 %v767_v57, 0.0  ;;  %v403_v60 = vpop.f32.mrb[11].mxu1 }
 0x218   :  { %v440_v62 = vmax.f32 %v403_v60, 0.0 }
 0x219   :  { %v452_v63 = vpack.c.bf16 %v442_v59, %v441_v58 }
 0x21a   :  { %v451_v0 = vpack.c.bf16 %v440_v62, %v439_v61 }
 0x21c   :  { %v770_v1 = vpop.f32.mrb[12].mxu1  ;;  %796 = vmatprep.mubr.bf16.mxu0 %v451_v0 }
 0x21d   :  { %v416_v2 = vpop.f32.mrb[13].mxu1  ;;  %797 = vmatmul.mubr.bf16.gmra.mrb[24].mxu0 %v452_v63  ;;  %v445_v4 = vmax.f32 %v770_v1, 0.0 }
 0x21e   :  { %v771_v3 = vpop.f32.mrb[14].mxu1  ;;  %v443_v7 = vmax.f32 %v416_v2, 0.0 }
 0x21f   :  { %v446_v5 = vmax.f32 %v771_v3, 0.0  ;;  %v419_v6 = vpop.f32.mrb[15].mxu1 }
 0x220   :  { %v444_v8 = vmax.f32 %v419_v6, 0.0 }
 0x221   :  { %v454_v9 = vpack.c.bf16 %v446_v5, %v445_v4 }
 0x222   :  { %v453_v10 = vpack.c.bf16 %v444_v8, %v443_v7 }
 0x224   :  { %800 = vmatprep.mubr.bf16.mxu0 %v453_v10 }
 0x225   :  { %801 = vmatmul.mubr.bf16.gmra.mrb[28].mxu0 %v454_v9 }
 0x2e0   :  { %v790_v11 = vpop.f32.mrb[16].mxu0 }
 0x2e1   :  { %618 = vst [vmem:[#allocation10 + $0x10] sm:$0xff] %v790_v11  ;;  %v553_v12 = vpop.f32.mrb[17].mxu0 }
 0x2e2   :  { %616 = vst [vmem:[#allocation10] sm:$0xff] %v553_v12  ;;  %v791_v13 = vpop.f32.mrb[18].mxu0 }
 0x2e3   :  { %619 = vst [vmem:[#allocation10 + $0x18] sm:$0xff] %v791_v13  ;;  %v556_v14 = vpop.f32.mrb[19].mxu0 }
 0x2e4   :  { %617 = vst [vmem:[#allocation10 + $0x8] sm:$0xff] %v556_v14 }
 0x2e8   :  { %v794_v15 = vpop.f32.mrb[20].mxu0 }
 0x2e9   :  { %622 = vst [vmem:[#allocation10 + $0x30] sm:$0xff] %v794_v15  ;;  %v569_v16 = vpop.f32.mrb[21].mxu0 }
 0x2ea   :  { %620 = vst [vmem:[#allocation10 + $0x20] sm:$0xff] %v569_v16  ;;  %v795_v17 = vpop.f32.mrb[22].mxu0 }
 0x2eb   :  { %623 = vst [vmem:[#allocation10 + $0x38] sm:$0xff] %v795_v17  ;;  %v572_v18 = vpop.f32.mrb[23].mxu0 }
 0x2ec   :  { %621 = vst [vmem:[#allocation10 + $0x28] sm:$0xff] %v572_v18 }
 0x2f0   :  { %v798_v19 = vpop.f32.mrb[24].mxu0 }
 0x2f1   :  { %626 = vst [vmem:[#allocation10 + $0x50] sm:$0xff] %v798_v19  ;;  %v585_v20 = vpop.f32.mrb[25].mxu0 }
 0x2f2   :  { %624 = vst [vmem:[#allocation10 + $0x40] sm:$0xff] %v585_v20  ;;  %v799_v21 = vpop.f32.mrb[26].mxu0 }
 0x2f3   :  { %627 = vst [vmem:[#allocation10 + $0x58] sm:$0xff] %v799_v21  ;;  %v588_v22 = vpop.f32.mrb[27].mxu0 }
 0x2f4   :  { %625 = vst [vmem:[#allocation10 + $0x48] sm:$0xff] %v588_v22 }
 0x2f8   :  { %v802_v23 = vpop.f32.mrb[28].mxu0 }
 0x2f9   :  { %630 = vst [vmem:[#allocation10 + $0x70] sm:$0xff] %v802_v23  ;;  %v601_v24 = vpop.f32.mrb[29].mxu0 }
 0x2fa   :  { %628 = vst [vmem:[#allocation10 + $0x60] sm:$0xff] %v601_v24  ;;  %v803_v25 = vpop.f32.mrb[30].mxu0 }
 0x2fb   :  { %631 = vst [vmem:[#allocation10 + $0x78] sm:$0xff] %v803_v25  ;;  %v604_v26 = vpop.f32.mrb[31].mxu0 }
 0x2fc   :  { %629 = vst [vmem:[#allocation10 + $0x68] sm:$0xff] %v604_v26 }
 0x2fd   :  { %930 = shalt.err (!%p927_p8)
}
 0x2fe   :  { %s931_s23 = scalar_lea.hbm %s1086_s5, 2048 }
 0x2ff   :  { %p932_p9 = scmp.ne.s32.totalorder %s1086_s5, %s931_s23  ;;  %p935_p10 = scmp.lt.u32.totalorder %s931_s23, %s1086_s5 }
 0x301   :  { %p937_p11 = pnand %p935_p10, %p932_p9 }
 0x303   :  { %940 = shalt.err (!%p937_p11)
}
 0x304   :  { %643 = dma.vmem_to_hbm [thread:$0]  %s638_s29, 2048, %s1086_s5, [#allocation4], %s953_s1, %s953_s1, %s954_s17  }
 0x305   :  { %947 = dma.done.wait [#allocation4], 2048  }
 0x306   :  { %948 = vsyncadd [#allocation4], 4294965248 }
 0x307   :  { %647 = vsyncpa [#allocation3], 1 }
 0x308   :  { %648 = vsyncpa [#allocation6], 1 }
 0x309   :  { %649 = vsyncpa [#allocation9], 1 }
 0x30a   :  { %650 = vsyncpa [#allocation4], 1 }

</bundles_post_ra>
